<compile_context>
chip_gen: v5e
topology: v5e:2x2
jax: 0.10.0
libtpu: 0.0.40
codegen_flags: <defaults>
</compile_context>

<pallas_src>
import jax
import jax.numpy as jnp
from jax.experimental import pallas as pl
from jax.experimental.pallas import tpu as pltpu


def _round_up(x, m):
    return ((x + m - 1) // m) * m


_TARGET_BLOCK_ELEMS = 256 * 1024  # ~1 MiB per f32 block (x) -> ~4 MiB live
                                  # with double-buffered in + out blocks.


def _choose_tiles(rows, length):
    """Pick (row_tile, lane_tile) for a flattened (rows, length) f32 array."""
    # Lane (last) dim: keep it lane-dense (multiple of 128, >=512 when L is
    # large) so stores are unmasked full-vreg vst; otherwise fall back to the
    # full extent, which is always a legal block dim.
    if length % 128 == 0:
        t_l = min(length, 1024)
    else:
        t_l = length
    # Sublane (row) dim: multiple of 8, sized so one block is ~1 MiB of f32,
    # which amortizes the ~0.35 us/step grid overhead and sits well under the
    # scoped-VMEM limits of all chip generations.
    t_r = min(max(_TARGET_BLOCK_ELEMS // max(t_l, 1), 1), rows)
    t_r = max(8, _round_up(t_r, 8))
    t_r = min(t_r, _round_up(rows, 8))
    return t_r, t_l


def _sparse_by_channel_kernel(x_ref, thr_ref, o_ref):
    # x_ref: (tR, tL); thr_ref: (tR, 1) -> cheap lane broadcast on the VPU.
    o_ref[...] = jnp.maximum(x_ref[...] - thr_ref[...], 0.0)


def spatially_sparse_by_channel_forward(x, thresholds,
                                        block_rows=None, block_cols=None):
    """Eval-mode forward of SpatiallySparseByChannel.

    x:          (N, C, L)
    thresholds: (C,)
    returns     (N, C, L), same dtype as x (no upcast).
    """
    N, C, L = x.shape
    R = N * C
    x2d = x.reshape(R, L)
    # Row r of the flattened view is (n, c) with c = r % C, so the per-row
    # threshold vector is just the channel thresholds tiled over the batch.
    thr_rows = jnp.tile(thresholds.astype(x.dtype), N).reshape(R, 1)

    t_r, t_l = _choose_tiles(R, L)
    if block_rows is not None:
        t_r = block_rows
    if block_cols is not None:
        t_l = block_cols

    grid = (pl.cdiv(R, t_r), pl.cdiv(L, t_l))

    out2d = pl.pallas_call(
        _sparse_by_channel_kernel,
        out_shape=jax.ShapeDtypeStruct((R, L), x.dtype),
        grid_spec=pltpu.PrefetchScalarGridSpec(
            num_scalar_prefetch=0,
            grid=grid,
            in_specs=[
                pl.BlockSpec((t_r, t_l), lambda i, j: (i, j)),
                pl.BlockSpec((t_r, 1), lambda i, j: (i, 0)),
            ],
            out_specs=pl.BlockSpec((t_r, t_l), lambda i, j: (i, j)),
        ),
        compiler_params=pltpu.CompilerParams(
            dimension_semantics=("parallel", "parallel"),
            vmem_limit_bytes=32 * 1024 * 1024,
        ),
    )(x2d, thr_rows)
    return out2d.reshape(N, C, L)


def update_thresholds_train(x, thresholds, sparsity, momentum=0.1):
    """Training-mode threshold EMA update (plain-JAX glue, not a kernel).

    Matches:
        to_drop = max(1, int(N * L * sparsity))
        kth = torch.kthvalue(x.transpose(1,2).reshape(N*L, C), k=to_drop, dim=0)
        thresholds = thresholds * (1 - momentum) + kth * momentum
    """
    # TODO(synk): torch.kthvalue (per-channel order statistic) has no clean
    # Pallas equivalent; implemented with jnp.partition (O(N*L) selection).
    N, C, L = x.shape
    to_drop = max(1, int(N * L * sparsity))
    flat = jnp.transpose(x, (0, 2, 1)).reshape(N * L, C)        # (N*L, C)
    kth = jnp.partition(flat, to_drop - 1, axis=0)[to_drop - 1]  # (C,)
    return thresholds * (1.0 - momentum) + kth * momentum


def _reference_forward(x, thresholds):
    return jnp.maximum(x - thresholds[None, :, None].astype(x.dtype), 0.0)


if __name__ == "__main__":
    key = jax.random.PRNGKey(0)
    sparsity = 0.75
    momentum = 0.1

    # --- primary small-shape check (module-consistent shapes) ---------------
    N, C, L = 2, 4, 16
    kx, key = jax.random.split(key)
    x = jax.random.normal(kx, (N, C, L), dtype=jnp.float32)
    # Module starts thresholds at zero; emulate one training EMA step so the
    # subtraction is non-trivial.
    thresholds = jnp.zeros((C,), dtype=jnp.float32)
    thresholds = update_thresholds_train(x, thresholds, sparsity, momentum)

    out = spatially_sparse_by_channel_forward(x, thresholds)
    out = jax.block_until_ready(out)
    assert out.shape == (N, C, L)
    assert jnp.allclose(out, _reference_forward(x, thresholds), atol=1e-6), \
        "mismatch vs reference (primary)"

    # --- ragged L (not a multiple of 128): lane tile = full extent ----------
    N2, C2, L2 = 2, 4, 200
    kx, key = jax.random.split(key)
    x2 = jax.random.normal(kx, (N2, C2, L2), dtype=jnp.float32)
    kt, key = jax.random.split(key)
    thr2 = jax.random.normal(kt, (C2,), dtype=jnp.float32) * 0.1
    out2 = jax.block_until_ready(
        spatially_sparse_by_channel_forward(x2, thr2))
    assert jnp.allclose(out2, _reference_forward(x2, thr2), atol=1e-6), \
        "mismatch vs reference (ragged L)"

    # --- multi-block 2D tiling (explicit (8,128)-aligned tiles) -------------
    N3, C3, L3 = 4, 16, 256
    kx, key = jax.random.split(key)
    x3 = jax.random.normal(kx, (N3, C3, L3), dtype=jnp.float32)
    kt, key = jax.random.split(key)
    thr3 = jax.random.normal(kt, (C3,), dtype=jnp.float32) * 0.1
    out3 = jax.block_until_ready(
        spatially_sparse_by_channel_forward(x3, thr3,
                                            block_rows=16, block_cols=128))
    assert jnp.allclose(out3, _reference_forward(x3, thr3), atol=1e-6), \
        "mismatch vs reference (tiled)"

    print("KERNEL_OK")
</pallas_src>

<mosaic_0001>
module attributes {stable_mosaic.version = 11 : i64} {
  func.func @_sparse_by_channel_kernel(%arg0: i32, %arg1: i32, %arg2: memref<8x16xf32, #tpu.memory_space<vmem>>, %arg3: memref<8x1xf32, #tpu.memory_space<vmem>>, %arg4: memref<8x16xf32, #tpu.memory_space<vmem>>) attributes {dimension_semantics = [#tpu.dimension_semantics<parallel>, #tpu.dimension_semantics<parallel>], iteration_bounds = array<i64: 1, 1>, scalar_prefetch = 0 : i64, scratch_operands = 0 : i64, tpu.core_type = #tpu.core_type<tc>, window_params = [{transform_indices = @transform_0, window_bounds = array<i64: 8, 16>}, {transform_indices = @transform_1, window_bounds = array<i64: 8, 1>}, {transform_indices = @transform_2, window_bounds = array<i64: 8, 16>}]} {
    %c0 = arith.constant 0 : index
    %c0_0 = arith.constant 0 : index
    %0 = vector.load %arg2[%c0, %c0_0] : memref<8x16xf32, #tpu.memory_space<vmem>>, vector<8x16xf32>
    %c0_1 = arith.constant 0 : index
    %c0_2 = arith.constant 0 : index
    %1 = vector.load %arg3[%c0_1, %c0_2] : memref<8x1xf32, #tpu.memory_space<vmem>>, vector<8x1xf32>
    %2 = vector.broadcast %1 : vector<8x1xf32> to vector<8x16xf32>
    %3 = arith.subf %0, %2 : vector<8x16xf32>
    %cst = arith.constant 0.000000e+00 : f32
    %4 = vector.broadcast %cst : f32 to vector<8x16xf32>
    %5 = arith.maximumf %3, %4 : vector<8x16xf32>
    %c0_3 = arith.constant 0 : index
    %c0_4 = arith.constant 0 : index
    %6 = vector.load %arg4[%c0_3, %c0_4] : memref<8x16xf32, #tpu.memory_space<vmem>>, vector<8x16xf32>
    tpu.vector_store %arg4[%c0_3, %c0_4], %5 {strides = array<i32>} : memref<8x16xf32, #tpu.memory_space<vmem>>, vector<8x16xf32>,
    return
  }
  func.func @transform_0(%arg0: i32, %arg1: i32) -> (i32, i32) {
    %c0_i32 = arith.constant 0 : i32
    return %arg0, %arg1 : i32, i32
  }
  func.func @transform_1(%arg0: i32, %arg1: i32) -> (i32, i32) {
    %c0_i32 = arith.constant 0 : i32
    %c0_i32_0 = arith.constant 0 : i32
    return %arg0, %c0_i32 : i32, i32
  }
  func.func @transform_2(%arg0: i32, %arg1: i32) -> (i32, i32) {
    %c0_i32 = arith.constant 0 : i32
    return %arg0, %arg1 : i32, i32
  }
}

</mosaic_0001>

<bundles_post_ra>
// kernel: tpu_custom_call.1
= control target key start
LH: loop header
LB: loop body
LE: loop exit
PB: predicated region body
PF: predicated region fallthrough
CT: control target
= control target key end

     0   :  { %s94_s0 = inlined_call_operand.vmem [shape: f32[8,16], index: 0, kind: input, shape index: {}]   ;;  %s95_s1 = inlined_call_operand.vmem [shape: f32[8,1], index: 1, kind: input, shape index: {}]   ;;  %s96_s2 = inlined_call_operand.hbm [shape: f32[8,16], index: 2, kind: output, shape index: {}]  }
   0x1   :  { %v13_v0 = vld [vmem:[%s95_s1] sm:$0xff] }
   0x2   :  { %7 = vsyncpa [#allocation3], 0  ;;  %v68_v1 = vmov 0   ;;  %v12_v2 = vld [vmem:[%s94_s0] sm:$0xff]  ;;  %s69_s13 = smov [#allocation2]   ;;  %s30_s17 = sshll.u32 %s96_s2, 4  ;;  %s31_s17 = int_to_ptr.hbm [resolvable:$true] %s30_s17 }
   0x3   :  { %41 = vset.pattern.permute.xlu0 %v68_v1  ;;  %s28_s14 = sshll.u32 %s69_s13, 4  ;;  %vm21_vm0 = vcmask 130048   ;;  %s29_s14 = int_to_ptr.vmem [resolvable:$true] %s28_s14 }
   0x4   :  { %16 = vperm.xlu0 %41, %v13_v0  }
  0x76   :  { %v17_v3 = vpop.permute.xlu0 %16 }
  0x77   :  { %v19_v4 = vsub.f32 %v12_v2, %v17_v3 }
  0x79   :  { %v20_v5 = vmax.f32 %v19_v4, 0.0 }
  0x7b   :  { %22 = vst.msk [vmem:[#allocation2] sm:$0xff] %vm21_vm0, %v20_v5 }
  0x7c   :  { %33 = dma.vmem_to_hbm [thread:$0]  %s29_s14, 128, %s31_s17, [#allocation3]  }
  0x7d   :  { %66 = dma.done.wait [#allocation3], 128  }
  0x7e   :  { %67 = vsyncadd [#allocation3], 4294967168 }
  0x7f   :  { %38 = vsyncpa [#allocation3], 1 }

</bundles_post_ra>
